<compile_context>
chip_gen: v5e
topology: v5e:2x2
jax: 0.10.0
libtpu: 0.0.40
codegen_flags: <defaults>
</compile_context>

<pallas_src>
import jax
import jax.numpy as jnp
from jax.experimental import pallas as pl
from jax.experimental.pallas import tpu as pltpu

_MIB = 1024 * 1024
_LANE = 128
_MIN_LANES = 512          # DMA-efficiency floor for tiled HW (multiple of 128)
_MIN_GRID_STEPS = 4       # keep both v7x TCs busy + allow pipeline overlap


def _disparity_regression_kernel(x_ref, disp_ref, o_ref):
    # x_ref:    (D, T) disparity probabilities for one batch / HW tile.
    # disp_ref: (D, 1) float32 disparity values, VMEM-resident across steps.
    # o_ref:    (1, T) expected disparity.
    x = x_ref[...].astype(jnp.float32)          # no-op for f32 inputs
    w = x * disp_ref[...]                       # lane-broadcast of (D, 1)
    o_ref[...] = jnp.sum(w, axis=0, keepdims=True).astype(o_ref.dtype)


def _vmem_plan():
    """Return (input-tile budget, vmem_limit_bytes) sized to this chip."""
    try:
        cap = pltpu.get_tpu_info().vmem_capacity_bytes
    except Exception:
        cap = 64 * _MIB                          # conservative: assume v7x
    if cap >= 96 * _MIB:                         # v5e / v6e: 128 MiB VMEM
        return 48 * _MIB, 96 * _MIB
    return 24 * _MIB, 56 * _MIB                  # v7x: 64 MiB VMEM


def _round_down_lane(v):
    return max(_LANE, (v // _LANE) * _LANE)


def _round_up_lane(v):
    return max(_LANE, ((v + _LANE - 1) // _LANE) * _LANE)


def _pick_hw_tile(d, hw, n, in_bytes, out_bytes, budget_bytes):
    """Lane-dense HW tile: as large as the VMEM budget allows, but split enough
    to give every TensorCore several pipelined grid steps."""
    if hw <= _MIN_LANES:
        return hw                                # too small to be worth splitting
    # Double-buffered input column + double-buffered output lane.
    per_lane = 2 * (d * in_bytes + out_bytes)
    tile = min(hw, _round_down_lane(budget_bytes // per_lane))
    # Ensure at least _MIN_GRID_STEPS total grid steps (megacore sharding on
    # v7x + DMA/compute overlap everywhere), but never drop below the
    # 512-lane DMA-efficiency floor.
    if n * pl.cdiv(hw, tile) < _MIN_GRID_STEPS:
        want_tiles = pl.cdiv(_MIN_GRID_STEPS, n)
        candidate = max(_MIN_LANES, _round_up_lane(pl.cdiv(hw, want_tiles)))
        if candidate < hw:
            tile = min(tile, candidate)
    return int(max(_MIN_LANES, min(tile, hw)))


def disparity_regression(x, maxdisp):
    """x: (N, D, H, W) with D == maxdisp. Returns (N, H, W) in x.dtype."""
    N, D, H, W = x.shape
    assert D == int(maxdisp), (D, maxdisp)
    HW = H * W
    x_flat = x.reshape(N, D, HW)

    in_bytes = jnp.dtype(x.dtype).itemsize
    out_bytes = in_bytes
    budget_bytes, vmem_limit_bytes = _vmem_plan()
    hw_tile = _pick_hw_tile(D, HW, N, in_bytes, out_bytes, budget_bytes)
    num_hw_tiles = pl.cdiv(HW, hw_tile)

    # Tiny, VMEM-resident disparity column (constant index_map below).
    disp_col = jnp.arange(D, dtype=jnp.float32).reshape(D, 1)

    out = pl.pallas_call(
        _disparity_regression_kernel,
        out_shape=jax.ShapeDtypeStruct((N, 1, HW), x.dtype),
        grid_spec=pltpu.PrefetchScalarGridSpec(
            num_scalar_prefetch=0,
            grid=(N, num_hw_tiles),
            in_specs=[
                # Full disparity axis per block; HW tiled lane-dense.
                pl.BlockSpec((None, D, hw_tile), lambda n, j: (n, 0, j)),
                # Disparity weights: same block every step -> fetched once.
                pl.BlockSpec((D, 1), lambda n, j: (0, 0)),
            ],
            out_specs=pl.BlockSpec((None, 1, hw_tile), lambda n, j: (n, 0, j)),
        ),
        compiler_params=pltpu.CompilerParams(
            dimension_semantics=("parallel", "parallel"),
            vmem_limit_bytes=vmem_limit_bytes,
        ),
        cost_estimate=pl.CostEstimate(
            flops=2 * N * D * HW,
            transcendentals=0,
            bytes_accessed=N * D * HW * in_bytes + N * HW * out_bytes + D * 4,
        ),
    )(x_flat, disp_col)

    return out.reshape(N, H, W)


def disparity_regression_reference(x, maxdisp):
    """Pure-JAX reference matching the PyTorch module exactly."""
    disp = jnp.arange(maxdisp, dtype=jnp.float32).reshape(1, maxdisp, 1, 1)
    return jnp.sum(x.astype(jnp.float32) * disp, axis=1).astype(x.dtype)


if __name__ == "__main__":
    key = jax.random.PRNGKey(0)
    k1, k2 = jax.random.split(key)

    # Case 1: typical small shape, float32 softmax probabilities.
    N, H, W = 2, 16, 16
    maxdisp = 32
    logits = jax.random.normal(k1, (N, maxdisp, H, W), dtype=jnp.float32)
    x = jax.nn.softmax(logits, axis=1)
    out = jax.block_until_ready(disparity_regression(x, maxdisp))
    ref = disparity_regression_reference(x, maxdisp)
    assert out.shape == (N, H, W), out.shape
    assert jnp.allclose(out, ref, atol=1e-4, rtol=1e-4), (
        float(jnp.max(jnp.abs(out - ref))))

    # Case 2: H*W > tile floor and not a multiple of the tile -> ragged last
    # HW tile exercises Pallas' OOB-input padding / masked-output stores.
    N2, D2, H2, W2 = 1, 16, 24, 24              # HW = 576 -> tiles of 512 + 64
    logits2 = jax.random.normal(k2, (N2, D2, H2, W2), dtype=jnp.float32)
    x2 = jax.nn.softmax(logits2, axis=1)
    out2 = jax.block_until_ready(disparity_regression(x2, D2))
    ref2 = disparity_regression_reference(x2, D2)
    assert out2.shape == (N2, H2, W2), out2.shape
    assert bool(jnp.all(jnp.isfinite(out2)))
    assert jnp.allclose(out2, ref2, atol=1e-4, rtol=1e-4), (
        float(jnp.max(jnp.abs(out2 - ref2))))

    # Case 3: bf16 probabilities (half the HBM traffic); f32 accumulation.
    x3 = x.astype(jnp.bfloat16)
    out3 = jax.block_until_ready(disparity_regression(x3, maxdisp))
    ref3 = disparity_regression_reference(x3, maxdisp)
    assert jnp.allclose(out3.astype(jnp.float32), ref3.astype(jnp.float32),
                        atol=0.2, rtol=0.02), (
        float(jnp.max(jnp.abs(out3.astype(jnp.float32) -
                              ref3.astype(jnp.float32)))))

    print("KERNEL_OK")
</pallas_src>

<mosaic_0001>
module attributes {stable_mosaic.version = 11 : i64} {
  func.func @_disparity_regression_kernel(%arg0: i32, %arg1: i32, %arg2: memref<1x32x256xf32, #tpu.memory_space<vmem>>, %arg3: memref<32x1xf32, #tpu.memory_space<vmem>>, %arg4: memref<1x1x256xf32, #tpu.memory_space<vmem>>) attributes {dimension_semantics = [#tpu.dimension_semantics<parallel>, #tpu.dimension_semantics<parallel>], iteration_bounds = array<i64: 2, 1>, scalar_prefetch = 0 : i64, scratch_operands = 0 : i64, tpu.core_type = #tpu.core_type<tc>, window_params = [{transform_indices = @transform_0, window_bounds = array<i64: 1, 32, 256>}, {pipeline_mode = #tpu.pipeline_mode<synchronous>, transform_indices = @transform_1, window_bounds = array<i64: 32, 1>}, {transform_indices = @transform_2, window_bounds = array<i64: 1, 1, 256>}]} {
    %c0 = arith.constant 0 : index
    %c0_0 = arith.constant 0 : index
    %c0_1 = arith.constant 0 : index
    %0 = vector.load %arg2[%c0, %c0_0, %c0_1] : memref<1x32x256xf32, #tpu.memory_space<vmem>>, vector<1x32x256xf32>
    %1 = vector.shape_cast %0 : vector<1x32x256xf32> to vector<32x256xf32>
    %c0_2 = arith.constant 0 : index
    %c0_3 = arith.constant 0 : index
    %2 = vector.load %arg3[%c0_2, %c0_3] : memref<32x1xf32, #tpu.memory_space<vmem>>, vector<32x1xf32>
    %3 = vector.broadcast %2 : vector<32x1xf32> to vector<32x256xf32>
    %4 = arith.mulf %1, %3 : vector<32x256xf32>
    %cst = arith.constant dense<0.000000e+00> : vector<256xf32>
    %5 = vector.multi_reduction <add>, %4, %cst [0] : vector<32x256xf32> to vector<256xf32>
    %6 = vector.shape_cast %5 : vector<256xf32> to vector<1x256xf32>
    %c0_4 = arith.constant 0 : index
    %c0_5 = arith.constant 0 : index
    %c0_6 = arith.constant 0 : index
    %7 = vector.load %arg4[%c0_4, %c0_5, %c0_6] : memref<1x1x256xf32, #tpu.memory_space<vmem>>, vector<1x1x256xf32>
    %8 = vector.shape_cast %7 : vector<1x1x256xf32> to vector<1x256xf32>
    %9 = vector.shape_cast %6 : vector<1x256xf32> to vector<1x1x256xf32>
    tpu.vector_store %arg4[%c0_4, %c0_5, %c0_6], %9 {strides = array<i32>} : memref<1x1x256xf32, #tpu.memory_space<vmem>>, vector<1x1x256xf32>,
    return
  }
  func.func @transform_0(%arg0: i32, %arg1: i32) -> (i32, i32, i32) {
    %c0_i32 = arith.constant 0 : i32
    %c0_i32_0 = arith.constant 0 : i32
    return %arg0, %c0_i32, %arg1 : i32, i32, i32
  }
  func.func @transform_1(%arg0: i32, %arg1: i32) -> (i32, i32) {
    %c0_i32 = arith.constant 0 : i32
    %c0_i32_0 = arith.constant 0 : i32
    %c0_i32_1 = arith.constant 0 : i32
    return %c0_i32, %c0_i32_0 : i32, i32
  }
  func.func @transform_2(%arg0: i32, %arg1: i32) -> (i32, i32, i32) {
    %c0_i32 = arith.constant 0 : i32
    %c0_i32_0 = arith.constant 0 : i32
    return %arg0, %c0_i32, %arg1 : i32, i32, i32
  }
}

</mosaic_0001>

<bundles_post_ra>
// kernel: tpu_custom_call.1
= control target key start
LH: loop header
LB: loop body
LE: loop exit
PB: predicated region body
PF: predicated region fallthrough
CT: control target
= control target key end

     0   :  { %7 = vsyncpa [#allocation3], 0  ;;  %s701_s0 = inlined_call_operand.hbm [shape: f32[2,32,256], index: 0, kind: input, shape index: {}]   ;;  %s702_s1 = inlined_call_operand.vmem [shape: f32[32,1], index: 1, kind: input, shape index: {}]   ;;  %s703_s2 = inlined_call_operand.hbm [shape: f32[2,1,256], index: 2, kind: output, shape index: {}]  }
   0x1   :  { %9 = vsyncpa [#allocation3 + $0x1], 0 }
   0x2   :  { %10 = vsyncpa [#allocation4], 0 }
   0x3   :  { %12 = vsyncpa [#allocation4 + $0x1], 0  ;;  %s568_s9 = smov 0   ;;  %s570_s10 = smov 0  }
   0x4   :  { %s572_s11 = smov 0   ;;  %s574_s12 = smov 0  }
   0x5   :  { %s576_s13 = smov 0   ;;  %s578_s14 = smov 0  }
   0x6 LB: > { %s354_s15 = sadd.s32 4294967295, %s548_s14   ;;  %s355_s16 = sadd.s32 4294967294, %s548_s14   ;;  %s548_s14 = sphi %s578_s14, %s18_s14   ;;  %s544_s13 = sphi %s576_s13, %s712_s13   ;;  %s540_s12 = sphi %s574_s12, %s711_s12   ;;  %s536_s11 = sphi %s572_s11, %s710_s11   ;;  %s532_s10 = sphi %s570_s10, %s709_s10   ;;  %s528_s9 = sphi %s568_s9, %s708_s9  }
   0x7   : > { %s30_s17 = sadd.s32 1, %s544_s13  ;;  %s39_s18 = sadd.s32 1, %s536_s11 }
   0x8   : > { %p32_p0 = scmp.ge.s32.totalorder %s30_s17, 2  ;;  %p46_p1 = scmp.ne.s32.totalorder %s536_s11, %s532_s10 }
   0x9   : > { %p47_p2 = scmp.eq.s32.totalorder %s548_s14, 0  ;;  %p52_p3 = scmp.ne.s32.totalorder %s532_s10, %s528_s9 }
   0xa   : > { %s714_s17 = smov (%p32_p0, %s30_s17), 0  ;;  %p53_p5 = scmp.eq.s32.totalorder %s354_s15, 0 }
   0xb   : > { %p609_p4 = por %p47_p2, %p46_p1  ;;  %s34_s20 = ssub.s32 %s544_s13, %s714_s17 }
   0xc   : > { %p99_p6 = scmp.eq.s32.totalorder %s354_s15, 1  ;;  %p37_p7 = scmp.eq.s32.totalorder %s34_s20, 0 }
   0xd   : > { %p615_p8 = por %p53_p5, %p52_p3  ;;  %p105_p10 = scmp.eq.s32.totalorder %s355_s16, 1 }
   0xe   : > { %p619_p9 = por %p99_p6, %p46_p1  ;;  %p357_p12 = scmp.ge.s32.totalorder %s548_s14, 2 }
   0xf   : > { %s624_s23 = scalar_select %p37_p7, %s536_s11, %s39_s18  }
  0x10   : > { %p626_p11 = por %p105_p10, %p52_p3  ;;  %p381_p13 = scmp.lt.s32.totalorder %s548_s14, 2 }
  0x11   : > { %s128_s25 = sand.u32 1, %s536_s11   ;;  %s368_s27 = sshll.u32 %s544_s13, 6 }
  0x12   : > { %s358_s26 = sshll.u32 %s128_s25, 6  ;;  %s139_s30 = scalar_lea.hbm %s701_s0, %s368_s27 }
  0x13   : > { %s132_s3 = scalar_lea.vmem [#allocation2], %s358_s26  ;;  %s140_s5 = sshll.u32 %s139_s30, 4  ;;  %s141_s5 = int_to_ptr.hbm [resolvable:$true] %s140_s5 }
  0x14   : > { %s142_s4 = sshll.u32 %s132_s3, 4  ;;  %p374_p0 = pnand %p381_p13, %p609_p4  ;;  %s143_s4 = int_to_ptr.vmem [resolvable:$true] %s142_s4 }
  0x15   : > { %p361_p1 = scmp.ge.s32.totalorder %s548_s14, 1  ;;  %s129_s6 = scalar_lea.sflag [#allocation3], %s128_s25 }
  0x16   : > { %s550_s7 = smov 256   ;;  %s551_s8 = smov 16  }
  0x17   : > { %376 = dma.hbm_to_vmem [thread:$0]  (!%p374_p0), %s141_s5, 1024, %s143_s4, %s129_s6, %s550_s7, %s550_s7, %s551_s8  }
  0x18   : > { %p150_p2 = scmp.lt.s32.totalorder %s548_s14, 3 }
  0x1a   : > { %p151_p3 = pnand %p361_p1, %p150_p2 }
  0x1b   : > { %s642_s15 = sand.u32 (!%p151_p3), 1, %s532_s10  }
  0x1c   : > { %154 = sbr.rel (%p151_p3) target bundleno = 185 (0xb9), region = 28  ;;  %s362_s16 = sshll.u32 (!%p151_p3), %s642_s15, 6 }
  0x1d   : > { %s157_s18 = scalar_lea.sflag (!%p151_p3), [#allocation3], %s642_s15  ;;  %s160_s20 = scalar_lea.vmem (!%p151_p3), [#allocation2], %s362_s16 }
  0x21   : > { %519 = dma.done.wait (%p615_p8), %s157_s18, 1024  }
  0x22   : > { %521 = vsyncadd (%p615_p8), %s157_s18, 4294966272  ;;  %v552_v0 = vmov 0   ;;  %v194_v1 = vld [vmem:[%s702_s1 + $0x10] sm:$0xff]  ;;  %v192_v2 = vld [vmem:[%s702_s1] sm:$0xff]  ;;  %s363_s3 = sshll.u32 %s642_s15, 1  ;;  %s365_s4 = sshll.u32 %s540_s12, 1  ;;  %v248_v41 = vlaneseq }
  0x23   : > { %435 = vset.pattern.permute.xlu1 %v552_v0  ;;  %434 = vset.pattern.permute.xlu0 %v552_v0  ;;  %v195_v3 = vld [vmem:[%s702_s1 + $0x18] sm:$0xff]  ;;  %v193_v4 = vld [vmem:[%s702_s1 + $0x8] sm:$0xff]  ;;  %v184_v7 = vld [vmem:[%s160_s20] sm:$0xff]  ;;  %s266_s7 = scalar_lea.hbm %s703_s2, %s365_s4  ;;  %s181_s8 = scalar_lea.vmem [#allocation5], %s363_s3  ;;  %vm245_vm0 = vcmask 1040384  }
  0x24   : > { %208 = vperm.xlu1 %435, %v194_v1   ;;  %198 = vperm.xlu0 %434, %v192_v2   ;;  %v185_v8 = vld [vmem:[%s160_s20 + $0x8] sm:$0xff]  ;;  %v186_v9 = vld [vmem:[%s160_s20 + $0x10] sm:$0xff]  ;;  %v187_v10 = vld [vmem:[%s160_s20 + $0x18] sm:$0xff]  ;;  %s268_s16 = sshll.u32 %s181_s8, 4  ;;  %s270_s18 = sshll.u32 %s266_s7, 4  ;;  %vm250_vm1 = vcmp.lt.s32.totalorder %v248_v41, 256  ;;  %s269_s16 = int_to_ptr.vmem [resolvable:$true] %s268_s16  ;;  %s271_s18 = int_to_ptr.hbm [resolvable:$true] %s270_s18 }
  0x25   : > { %v188_v11 = vld [vmem:[%s160_s20 + $0x20] sm:$0xff]  ;;  %v189_v12 = vld [vmem:[%s160_s20 + $0x28] sm:$0xff]  ;;  %v190_v19 = vld [vmem:[%s160_s20 + $0x30] sm:$0xff]  ;;  %s254_s12 = scalar_lea.sflag [#allocation4], %s642_s15  ;;  %s486_s27 = scalar_lea.hbm %s703_s2, 4 }
  0x26   : > { %v191_v20 = vld [vmem:[%s160_s20 + $0x38] sm:$0xff]  ;;  %s480_s20 = sshra.s32 %s271_s18, 4  ;;  %s481_s20 = int_to_ptr.hbm [resolvable:$true] %s480_s20 }
  0x27   : > { %s482_s19 = scalar_lea.hbm %s481_s20, 2  ;;  %p487_p7 = scmp.lt.s32.totalorder %s481_s20, %s703_s2 }
  0x28   : > { %p483_p4 = scmp.ne.s32.totalorder %s481_s20, %s482_s19  ;;  %p488_p8 = scmp.lt.s32.totalorder %s486_s27, %s482_s19 }
  0x2a   : > { %p484_p5 = pnand %p483_p4, %p619_p9  ;;  %p489_p10 = por %p488_p8, %p487_p7 }
  0x2c   : > { %213 = vperm.xlu1 %435, %v195_v3   ;;  %203 = vperm.xlu0 %434, %v193_v4   ;;  %p485_p6 = pneg %p484_p5 }
  0x2e   : > { %p490_p13 = pnand %p489_p10, %p485_p6 }
  0x96   : > { %v209_v5 = vpop.permute.xlu1 %208  ;;  %v199_v6 = vpop.permute.xlu0 %198 }
  0x97   : > { %v216_v14 = vmul.f32 %v199_v6, %v184_v7  ;;  %v217_v15 = vmul.f32 %v199_v6, %v185_v8  ;;  %v220_v21 = vmul.f32 %v209_v5, %v188_v11  ;;  %v221_v22 = vmul.f32 %v209_v5, %v189_v12 }
  0x9e   : > { %v204_v13 = vpop.permute.xlu0 %203  ;;  %v214_v18 = vpop.permute.xlu1 %213 }
  0x9f   : > { %v218_v16 = vmul.f32 %v204_v13, %v186_v9  ;;  %v219_v17 = vmul.f32 %v204_v13, %v187_v10  ;;  %v222_v25 = vmul.f32 %v214_v18, %v190_v19  ;;  %v223_v26 = vmul.f32 %v214_v18, %v191_v20 }
  0xa1   : > { %v224_v23 = vadd.f32 %v218_v16, %v216_v14  ;;  %v233_v24 = vadd.f32 %v219_v17, %v217_v15 }
  0xa3   : > { %v225_v27 = vadd.f32 %v224_v23, %v220_v21  ;;  %v234_v28 = vadd.f32 %v233_v24, %v221_v22 }
  0xa5   : > { %v226_v29 = vadd.f32 %v225_v27, %v222_v25  ;;  %v235_v30 = vadd.f32 %v234_v28, %v223_v26 }
  0xa7   : > { %v227_v31 = vrot.slane %v226_v29, 4  ;;  %v236_v32 = vrot.slane %v235_v30, 4 }
  0xa9   : > { %v228_v33 = vadd.f32 %v227_v31, %v226_v29  ;;  %v237_v34 = vadd.f32 %v236_v32, %v235_v30 }
  0xab   : > { %v229_v35 = vrot.slane %v228_v33, 2  ;;  %v238_v36 = vrot.slane %v237_v34, 2 }
  0xad   : > { %v230_v37 = vadd.f32 %v229_v35, %v228_v33  ;;  %v239_v38 = vadd.f32 %v238_v36, %v237_v34 }
  0xaf   : > { %v231_v39 = vrot.slane %v230_v37, 1  ;;  %v240_v40 = vrot.slane %v239_v38, 1 }
  0xb1   : > { %v241_v42 = vadd.f32 %v240_v40, %v239_v38  ;;  %v232_v43 = vadd.f32 %v231_v39, %v230_v37 }
  0xb3   : > { %v244_v44 = vrot.slane %v241_v42, 7 }
  0xb5   : > { %v246_v45 = vsel %vm245_vm0, %v232_v43, %v244_v44 }
  0xb6   : > { %252 = vst.msk [vmem:[%s181_s8] sm:$0x3] %vm250_vm1, %v246_v45 }
  0xb7   : > { %493 = shalt.err (!%p490_p13)
}
  0xb8   : > { %371 = dma.vmem_to_hbm [thread:$0]  (%p619_p9), %s269_s16, 32, %s271_s18, %s254_s12  }
  0xb9 PF: > { %s282_s15 = sand.u32 1, %s528_s9   ;;  %p378_p0 = pnand %p357_p12, %p626_p11 }
  0xba   : > { %s283_s30 = scalar_lea.sflag [#allocation4], %s282_s15 }
  0xbb   : > { %p379_p1 = pneg %p378_p0 }
  0xbd   : > { %523 = dma.done.wait (%p379_p1), %s283_s30, 32  }
  0xbe   : > { %525 = vsyncadd (%p379_p1), %s283_s30, 4294967264  ;;  %s18_s14 = sadd.s32 1, %s548_s14   ;;  %s708_s9 = smov %s532_s10 }
  0xbf   : > { %p15_p2 = scmp.ge.s32.totalorder %s18_s14, 4   ;;  %s709_s10 = smov %s536_s11 }
  0xc0   : > { %s710_s11 = smov %s624_s23  ;;  %s711_s12 = smov %s544_s13 }
  0xc1   : > { %s712_s13 = smov %s714_s17  ;;  %17 = sbr.rel (!%p15_p2) target bundleno = 6 (0x6), region = 73 }
  0xc6   :  { %289 = vsyncpa [#allocation3], 1 }
  0xc7   :  { %291 = vsyncpa [#allocation3 + $0x1], 1 }
  0xc8   :  { %292 = vsyncpa [#allocation4], 1 }
  0xc9   :  { %294 = vsyncpa [#allocation4 + $0x1], 1 }

</bundles_post_ra>
